<compile_context>
chip_gen: v7x
topology: tpu7x:2x2x1
jax: 0.10.0
libtpu: 0.0.40
codegen_flags: <defaults>
</compile_context>

<pallas_src>
from typing import Dict, Optional

import jax
import jax.numpy as jnp
from jax.experimental import pallas as pl
from jax.experimental.pallas import tpu as pltpu


def _round_up(x: int, m: int) -> int:
    return (x + m - 1) // m * m


def _loss_kernel(temp_ref, tgt_ref, ht_ref, wt_ref, nll_ref, kl_ref, *preds_ref):
    """temp_ref: SMEM (1,) f32.  tgt_ref: (1, T) int32 (lane-dense targets).
    ht_ref: (D, T) bf16 hidden states (tokens on lanes).  wt_ref: (V, D) bf16.
    Outputs (lane-dense): nll (1, T) f32, kl (1, T) f32, [preds (1, T) int32]."""
    v = wt_ref.shape[0]

    # Fold 1/temperature into the small (D, T) operand (not the (V, T) logits).
    inv_t = 1.0 / temp_ref[0]
    hs = (ht_ref[...].astype(jnp.float32) * inv_t).astype(jnp.bfloat16)

    # MXU: logits^T = W^T @ (h/T)^T   -> (V, T), f32 accumulation.
    logits = jnp.dot(wt_ref[...], hs, preferred_element_type=jnp.float32)

    # Numerically-stable softmax statistics, reduced over the vocab (sublane) axis
    # so every per-token result is already lane-dense (1, T).
    m = jnp.max(logits, axis=0, keepdims=True)          # (1, T)
    z = logits - m                                      # (V, T)
    e = jnp.exp(z)                                      # (V, T)
    s = jnp.sum(e, axis=0, keepdims=True)               # (1, T)
    sez = jnp.sum(e * z, axis=0, keepdims=True)         # (1, T)

    # Target log-prob via one-hot select (no dynamic gather on TPU).
    row = jax.lax.broadcasted_iota(jnp.int32, logits.shape, 0)       # (V, T)
    tz = jnp.sum(jnp.where(row == tgt_ref[...], z, 0.0),
                 axis=0, keepdims=True)                              # (1, T)

    logs = jnp.log(s)
    nll_ref[...] = logs - tz                                         # -log p[target]
    # KL(p || uniform) = sum p*logp + log V, without materializing p.
    kl_ref[...] = sez / s - logs + jnp.log(jnp.float32(v))

    if preds_ref:  # compile-time specialization on ret_preds
        is_max = logits == m
        cand = jnp.where(is_max, row.astype(jnp.float32), jnp.float32(v))
        preds_ref[0][...] = jnp.min(cand, axis=0, keepdims=True).astype(jnp.int32)


def _run_loss_kernel(h_t, w_t, targets, temperature, *, ret_preds, block_rows=256):
    """h_t: (D, N) f32, w_t: (V, D) bf16, targets: (N,) int.  Returns per-token
    nll (N,), kl (N,), preds (N,) or None."""
    d, n = h_t.shape
    v = w_t.shape[0]

    # Row-tile policy: single full block for small N, else 128-multiple tiles so
    # lane-dense (1, TILE) output blocks satisfy the (8, 128) block constraint.
    if n <= block_rows:
        tile = _round_up(n, 8)
    else:
        tile = _round_up(block_rows, 128)
    n_pad = _round_up(n, tile)
    grid = n_pad // tile
    pad = n_pad - n

    ht_p = jnp.pad(h_t.astype(jnp.bfloat16), ((0, 0), (0, pad)))      # (D, N_pad) bf16
    tgt_p = jnp.pad(targets.astype(jnp.int32), (0, pad)).reshape(1, n_pad)
    temp = jnp.array([temperature], dtype=jnp.float32)

    n_out = 3 if ret_preds else 2
    out_shape = [jax.ShapeDtypeStruct((1, n_pad), jnp.float32),       # nll
                 jax.ShapeDtypeStruct((1, n_pad), jnp.float32)]       # kl
    out_specs = [pl.BlockSpec((1, tile), lambda i: (0, i)),
                 pl.BlockSpec((1, tile), lambda i: (0, i))]
    if ret_preds:
        out_shape.append(jax.ShapeDtypeStruct((1, n_pad), jnp.int32))  # preds
        out_specs.append(pl.BlockSpec((1, tile), lambda i: (0, i)))

    # VMEM budget (explicit, conservative; stays well under v7x's 64 MiB).
    est = (2 * d * tile * 2 + 2 * v * d * 2 + 2 * tile * 4
           + 2 * n_out * tile * 4 + 8 * v * tile * 4)
    vmem_limit = int(min(48 * 1024 * 1024, max(16 * 1024 * 1024, 4 * est)))

    cost = pl.CostEstimate(
        flops=2 * n_pad * d * v + 10 * n_pad * v,
        transcendentals=n_pad * v + 4 * n_pad,
        bytes_accessed=2 * d * n_pad + 2 * v * d + 4 * n_pad + 4 * n_out * n_pad)

    outs = pl.pallas_call(
        _loss_kernel,
        out_shape=tuple(out_shape),
        grid_spec=pltpu.PrefetchScalarGridSpec(
            num_scalar_prefetch=0,
            grid=(grid,),
            in_specs=[
                pl.BlockSpec(memory_space=pltpu.MemorySpace.SMEM),     # temperature
                pl.BlockSpec((1, tile), lambda i: (0, i)),             # targets (lane-dense)
                pl.BlockSpec((d, tile), lambda i: (0, i)),             # hidden^T tile
                pl.BlockSpec((v, d), lambda i: (0, 0)),                # W^T resident
            ],
            out_specs=tuple(out_specs)),
        compiler_params=pltpu.CompilerParams(
            dimension_semantics=("parallel",),
            vmem_limit_bytes=vmem_limit),
        cost_estimate=cost,
    )(temp, tgt_p, ht_p, w_t)

    nll = outs[0][0, :n]
    kl = outs[1][0, :n]
    preds = outs[2][0, :n] if ret_preds else None
    return nll, kl, preds


class LossWrapper:
    """Concrete AbstractLossWrapper: embedding -> projection -> CE + kl_scale*KL."""

    def __init__(self, vocab_size: int = 128, hidden: int = 32, seed: int = 0,
                 block_rows: int = 256):
        k0, k1 = jax.random.split(jax.random.PRNGKey(seed))
        self.vocab_size = vocab_size
        self.hidden = hidden
        self.block_rows = block_rows
        # Deterministic synthetic parameters (no checkpoint load).
        self.embedding = (jax.random.normal(k0, (vocab_size, hidden), jnp.float32)
                          * (1.0 / jnp.sqrt(hidden)))
        self.w_out = (jax.random.normal(k1, (hidden, vocab_size), jnp.float32)
                      * (1.0 / jnp.sqrt(hidden)))
        # MXU-ready transposed bf16 weight (kept VMEM-resident across row tiles).
        self.w_out_t = self.w_out.T.astype(jnp.bfloat16)              # (V, D)

    def forward(self,
                data: Dict[str, jnp.ndarray],
                seq_len: int,
                ret_preds: bool,
                tforce: bool,
                gen_targs: bool,
                gen_ids: bool,
                no_grad: bool,
                kl_scale: float,
                temperature: float,
                top_k: Optional[int]) -> Dict[str, jnp.ndarray]:
        ids = data["input_ids"]                        # [B, seq_len+1] int32
        b = ids.shape[0]

        # Teacher forcing: inputs are gold tokens, targets are next tokens.
        # TODO(synk): autoregressive generation (tforce=False), top_k sampling,
        #             gen_targs / gen_ids paths have no single-kernel equivalent.
        inp = ids[:, :seq_len]
        tgt = ids[:, 1:seq_len + 1].reshape(b * seq_len)

        # Glue: embedding gather, then tokens-on-lanes transpose (layout plumbing).
        # TODO(synk): fuse the embedding gather into the kernel via scalar-prefetch
        #             row gather instead of materializing h in HBM.
        h = self.embedding[inp].reshape(b * seq_len, self.hidden)
        if no_grad:
            h = jax.lax.stop_gradient(h)
        h_t = h.T                                      # (D, N)

        nll, kl, preds = _run_loss_kernel(h_t, self.w_out_t, tgt, temperature,
                                          ret_preds=ret_preds,
                                          block_rows=self.block_rows)
        loss = jnp.mean(nll) + jnp.float32(kl_scale) * jnp.mean(kl)

        out = {"loss": loss, "nll": nll.reshape(b, seq_len)}
        if ret_preds:
            out["preds"] = preds.reshape(b, seq_len)
        return out

    __call__ = forward


def _reference(model: LossWrapper, ids, seq_len: int, kl_scale: float, temperature: float):
    """Pure-JAX reference replicating the kernel's bf16 input quantization."""
    inp = ids[:, :seq_len]
    tgt = ids[:, 1:seq_len + 1].reshape(-1)
    h = model.embedding[inp].reshape(-1, model.hidden)
    inv_t = jnp.float32(1.0) / jnp.float32(temperature)
    hs = (h.astype(jnp.bfloat16).astype(jnp.float32) * inv_t).astype(jnp.bfloat16)
    logits = hs.astype(jnp.float32) @ model.w_out.astype(jnp.bfloat16).astype(jnp.float32)
    logp = jax.nn.log_softmax(logits, axis=-1)
    p = jnp.exp(logp)
    nll = -jnp.take_along_axis(logp, tgt[:, None], axis=1)[:, 0]
    kl = jnp.sum(p * logp, axis=-1) + jnp.log(jnp.float32(model.vocab_size))
    loss = jnp.mean(nll) + jnp.float32(kl_scale) * jnp.mean(kl)
    return loss, nll, logits


if __name__ == "__main__":
    VOCAB, HIDDEN = 128, 32
    KL, TEMP = 0.1, 1.5

    # ---- Test 1: small shapes (B=2, seq=8) -> single row tile ----
    B, SEQ = 2, 8
    ids = jax.random.randint(jax.random.PRNGKey(0), (B, SEQ + 1), 0, VOCAB, dtype=jnp.int32)
    model = LossWrapper(vocab_size=VOCAB, hidden=HIDDEN, seed=0)
    out = model({"input_ids": ids}, seq_len=SEQ, ret_preds=True, tforce=True,
                gen_targs=False, gen_ids=False, no_grad=False,
                kl_scale=KL, temperature=TEMP, top_k=None)
    jax.block_until_ready(out["loss"])
    jax.block_until_ready(out["preds"])

    loss_ref, nll_ref, logits_ref = _reference(model, ids, SEQ, KL, TEMP)
    assert jnp.allclose(out["loss"], loss_ref, rtol=1e-4, atol=1e-4)
    assert jnp.allclose(out["nll"].reshape(-1), nll_ref, rtol=1e-4, atol=1e-4)
    pred_logit = jnp.take_along_axis(logits_ref, out["preds"].reshape(-1, 1), axis=1)[:, 0]
    assert jnp.all(pred_logit >= logits_ref.max(axis=-1) - 1e-5)

    # ---- Test 2: multi-tile grid (N=240, tile=128 -> grid=2) with row padding ----
    B2, SEQ2 = 4, 60
    ids2 = jax.random.randint(jax.random.PRNGKey(1), (B2, SEQ2 + 1), 0, VOCAB, dtype=jnp.int32)
    model2 = LossWrapper(vocab_size=VOCAB, hidden=HIDDEN, seed=0, block_rows=128)
    out2 = model2({"input_ids": ids2}, seq_len=SEQ2, ret_preds=True, tforce=True,
                  gen_targs=False, gen_ids=False, no_grad=False,
                  kl_scale=KL, temperature=TEMP, top_k=None)
    jax.block_until_ready(out2["loss"])
    loss_ref2, nll_ref2, logits_ref2 = _reference(model2, ids2, SEQ2, KL, TEMP)
    assert jnp.allclose(out2["loss"], loss_ref2, rtol=1e-4, atol=1e-4)
    assert jnp.allclose(out2["nll"].reshape(-1), nll_ref2, rtol=1e-4, atol=1e-4)
    pred_logit2 = jnp.take_along_axis(logits_ref2, out2["preds"].reshape(-1, 1), axis=1)[:, 0]
    assert jnp.all(pred_logit2 >= logits_ref2.max(axis=-1) - 1e-5)

    # ---- Test 3: ret_preds=False specialization (no argmax work emitted) ----
    out3 = model2({"input_ids": ids2}, seq_len=SEQ2, ret_preds=False, tforce=True,
                  gen_targs=False, gen_ids=False, no_grad=True,
                  kl_scale=KL, temperature=TEMP, top_k=None)
    jax.block_until_ready(out3["loss"])
    assert "preds" not in out3
    assert jnp.allclose(out3["loss"], out2["loss"], rtol=1e-5, atol=1e-5)

    print("KERNEL_OK")
</pallas_src>

<mosaic_0001>
module attributes {stable_mosaic.version = 11 : i64} {
  func.func @_loss_kernel(%arg0: i32, %arg1: memref<1xf32, #tpu.memory_space<smem>>, %arg2: memref<1x16xi32, #tpu.memory_space<vmem>>, %arg3: memref<32x16xbf16, #tpu.memory_space<vmem>>, %arg4: memref<128x32xbf16, #tpu.memory_space<vmem>>, %arg5: memref<1x16xf32, #tpu.memory_space<vmem>>, %arg6: memref<1x16xf32, #tpu.memory_space<vmem>>, %arg7: memref<1x16xi32, #tpu.memory_space<vmem>>) attributes {dimension_semantics = [#tpu.dimension_semantics<parallel>], iteration_bounds = array<i64: 1>, scalar_prefetch = 0 : i64, scratch_operands = 0 : i64, tpu.core_type = #tpu.core_type<tc>, window_params = [{transform_indices = @transform_0, window_bounds = array<i64: 1>}, {transform_indices = @transform_1, window_bounds = array<i64: 1, 16>}, {transform_indices = @transform_2, window_bounds = array<i64: 32, 16>}, {pipeline_mode = #tpu.pipeline_mode<synchronous>, transform_indices = @transform_3, window_bounds = array<i64: 128, 32>}, {transform_indices = @transform_4, window_bounds = array<i64: 1, 16>}, {transform_indices = @transform_5, window_bounds = array<i64: 1, 16>}, {transform_indices = @transform_6, window_bounds = array<i64: 1, 16>}]} {
    %c0 = arith.constant 0 : index
    %0 = memref.load %arg1[%c0] : memref<1xf32, #tpu.memory_space<smem>>
    %cst = arith.constant 1.000000e+00 : f32
    %1 = arith.divf %cst, %0 : f32
    %c0_0 = arith.constant 0 : index
    %c0_1 = arith.constant 0 : index
    %2 = vector.load %arg3[%c0_0, %c0_1] : memref<32x16xbf16, #tpu.memory_space<vmem>>, vector<32x16xbf16>
    %3 = arith.extf %2 : vector<32x16xbf16> to vector<32x16xf32>
    %4 = vector.broadcast %1 : f32 to vector<32x16xf32>
    %5 = arith.mulf %3, %4 : vector<32x16xf32>
    %6 = arith.truncf %5 : vector<32x16xf32> to vector<32x16xbf16>
    %c0_2 = arith.constant 0 : index
    %c0_3 = arith.constant 0 : index
    %7 = vector.load %arg4[%c0_2, %c0_3] : memref<128x32xbf16, #tpu.memory_space<vmem>>, vector<128x32xbf16>
    %cst_4 = arith.constant dense<0.000000e+00> : vector<128x16xf32>
    %8 = tpu.matmul %7, %6, %cst_4 {dimension_numbers = #tpu.dot_dimension_numbers<[1], [0], [0], [1], [0, 0, 1, 1], [], []>} : vector<128x32xbf16>, vector<32x16xbf16>, vector<128x16xf32> -> vector<128x16xf32>
    %cst_5 = arith.constant dense<0xFF800000> : vector<16xf32>
    %9 = vector.multi_reduction <maximumf>, %8, %cst_5 [0] : vector<128x16xf32> to vector<16xf32>
    %10 = vector.shape_cast %9 : vector<16xf32> to vector<1x16xf32>
    %11 = vector.broadcast %10 : vector<1x16xf32> to vector<128x16xf32>
    %12 = arith.subf %8, %11 : vector<128x16xf32>
    %13 = math.exp %12 : vector<128x16xf32>
    %cst_6 = arith.constant dense<0.000000e+00> : vector<16xf32>
    %14 = vector.multi_reduction <add>, %13, %cst_6 [0] : vector<128x16xf32> to vector<16xf32>
    %15 = vector.shape_cast %14 : vector<16xf32> to vector<1x16xf32>
    %16 = arith.mulf %13, %12 : vector<128x16xf32>
    %cst_7 = arith.constant dense<0.000000e+00> : vector<16xf32>
    %17 = vector.multi_reduction <add>, %16, %cst_7 [0] : vector<128x16xf32> to vector<16xf32>
    %18 = vector.shape_cast %17 : vector<16xf32> to vector<1x16xf32>
    %19 = tpu.iota {dimensions = array<i32: 0>} : vector<128x16xi32>
    %c0_8 = arith.constant 0 : index
    %c0_9 = arith.constant 0 : index
    %20 = vector.load %arg2[%c0_8, %c0_9] : memref<1x16xi32, #tpu.memory_space<vmem>>, vector<1x16xi32>
    %21 = vector.broadcast %20 : vector<1x16xi32> to vector<128x16xi32>
    %22 = arith.cmpi eq, %19, %21 : vector<128x16xi32>
    %cst_10 = arith.constant 0.000000e+00 : f32
    %23 = vector.broadcast %cst_10 : f32 to vector<128x16xf32>
    %24 = arith.select %22, %12, %23 : vector<128x16xi1>, vector<128x16xf32>
    %cst_11 = arith.constant dense<0.000000e+00> : vector<16xf32>
    %25 = vector.multi_reduction <add>, %24, %cst_11 [0] : vector<128x16xf32> to vector<16xf32>
    %26 = vector.shape_cast %25 : vector<16xf32> to vector<1x16xf32>
    %27 = math.log %15 : vector<1x16xf32>
    %28 = arith.subf %27, %26 : vector<1x16xf32>
    %c0_12 = arith.constant 0 : index
    %c0_13 = arith.constant 0 : index
    %29 = vector.load %arg5[%c0_12, %c0_13] : memref<1x16xf32, #tpu.memory_space<vmem>>, vector<1x16xf32>
    tpu.vector_store %arg5[%c0_12, %c0_13], %28 {strides = array<i32>} : memref<1x16xf32, #tpu.memory_space<vmem>>, vector<1x16xf32>,
    %30 = arith.divf %18, %15 : vector<1x16xf32>
    %31 = arith.subf %30, %27 : vector<1x16xf32>
    %cst_14 = arith.constant 1.280000e+02 : f32
    %32 = math.log %cst_14 : f32
    %33 = vector.broadcast %32 : f32 to vector<1x16xf32>
    %34 = arith.addf %31, %33 : vector<1x16xf32>
    %c0_15 = arith.constant 0 : index
    %c0_16 = arith.constant 0 : index
    %35 = vector.load %arg6[%c0_15, %c0_16] : memref<1x16xf32, #tpu.memory_space<vmem>>, vector<1x16xf32>
    tpu.vector_store %arg6[%c0_15, %c0_16], %34 {strides = array<i32>} : memref<1x16xf32, #tpu.memory_space<vmem>>, vector<1x16xf32>,
    %36 = vector.broadcast %10 : vector<1x16xf32> to vector<128x16xf32>
    %37 = arith.cmpf oeq, %8, %36 : vector<128x16xf32>
    %38 = arith.sitofp %19 : vector<128x16xi32> to vector<128x16xf32>
    %cst_17 = arith.constant 1.280000e+02 : f32
    %39 = vector.broadcast %cst_17 : f32 to vector<128x16xf32>
    %40 = arith.select %37, %38, %39 : vector<128x16xi1>, vector<128x16xf32>
    %cst_18 = arith.constant dense<0x7F800000> : vector<16xf32>
    %41 = vector.multi_reduction <minimumf>, %40, %cst_18 [0] : vector<128x16xf32> to vector<16xf32>
    %42 = vector.shape_cast %41 : vector<16xf32> to vector<1x16xf32>
    %43 = arith.fptosi %42 : vector<1x16xf32> to vector<1x16xi32>
    %c0_19 = arith.constant 0 : index
    %c0_20 = arith.constant 0 : index
    %44 = vector.load %arg7[%c0_19, %c0_20] : memref<1x16xi32, #tpu.memory_space<vmem>>, vector<1x16xi32>
    tpu.vector_store %arg7[%c0_19, %c0_20], %43 {strides = array<i32>} : memref<1x16xi32, #tpu.memory_space<vmem>>, vector<1x16xi32>,
    return
  }
  func.func @transform_0(%arg0: i32) -> i32 {
    %c0_i32 = arith.constant 0 : i32
    %c0_i32_0 = arith.constant 0 : i32
    return %c0_i32 : i32
  }
  func.func @transform_1(%arg0: i32) -> (i32, i32) {
    %c0_i32 = arith.constant 0 : i32
    %c0_i32_0 = arith.constant 0 : i32
    return %c0_i32, %arg0 : i32, i32
  }
  func.func @transform_2(%arg0: i32) -> (i32, i32) {
    %c0_i32 = arith.constant 0 : i32
    %c0_i32_0 = arith.constant 0 : i32
    return %c0_i32, %arg0 : i32, i32
  }
  func.func @transform_3(%arg0: i32) -> (i32, i32) {
    %c0_i32 = arith.constant 0 : i32
    %c0_i32_0 = arith.constant 0 : i32
    %c0_i32_1 = arith.constant 0 : i32
    return %c0_i32, %c0_i32_0 : i32, i32
  }
  func.func @transform_4(%arg0: i32) -> (i32, i32) {
    %c0_i32 = arith.constant 0 : i32
    %c0_i32_0 = arith.constant 0 : i32
    return %c0_i32, %arg0 : i32, i32
  }
  func.func @transform_5(%arg0: i32) -> (i32, i32) {
    %c0_i32 = arith.constant 0 : i32
    %c0_i32_0 = arith.constant 0 : i32
    return %c0_i32, %arg0 : i32, i32
  }
  func.func @transform_6(%arg0: i32) -> (i32, i32) {
    %c0_i32 = arith.constant 0 : i32
    %c0_i32_0 = arith.constant 0 : i32
    return %c0_i32, %arg0 : i32, i32
  }
}

</mosaic_0001>

<bundles_post_ra>
// kernel: tpu_custom_call.1
= control target key start
LH: loop header
LB: loop body
LE: loop exit
PB: predicated region body
PF: predicated region fallthrough
CT: control target
= control target key end

     0   :  { %13 = vsyncpa [#allocation4], 0  ;;  %vm99_vm0 = vcmask 261120   ;;  %s1504_s0 = inlined_call_operand.<no memory space> [shape: f32[1], index: 0, kind: input, shape index: {}]   ;;  %s1505_s1 = inlined_call_operand.vmem [shape: s32[1,16], index: 1, kind: input, shape index: {}]   ;;  %s1506_s2 = inlined_call_operand.vmem [shape: bf16[32,16], index: 2, kind: input, shape index: {}]   ;;  %s1507_s3 = inlined_call_operand.vmem [shape: bf16[128,32], index: 3, kind: input, shape index: {}]   ;;  %s1508_s4 = inlined_call_operand.hbm [shape: f32[1,16], index: 4, kind: output, shape index: {0}]   ;;  %s1509_s5 = inlined_call_operand.hbm [shape: f32[1,16], index: 5, kind: output, shape index: {1}]   ;;  %s1510_s6 = inlined_call_operand.hbm [shape: s32[1,16], index: 6, kind: output, shape index: {2}]  }
   0x1   :  { %v25_v0 = vstv %s1504_s0  ;;  %v693_v1 = vld [vmem:[%s1507_s3] sm:$0xff]  }
   0x2   :  { %701 = vrcp.f32 %v25_v0  ;;  %666 = vmatprep.mubr.msk.bf16.mxu0 %vm99_vm0, %v693_v1  ;;  %v695_v2 = vld [vmem:[%s1507_s3 + $0x20] sm:$0xff]  }
   0x3   :  { %674 = vmatprep.mubr.msk.bf16.mxu1 %vm99_vm0, %v695_v2 }
   0x4   :  { %14 = vsyncpa [#allocation6], 0  ;;  %v644_v4 = vld [vmem:[%s1506_s2] sm:$0xff]   ;;  %v651_v5 = vld [vmem:[%s1506_s2 + $0x8] sm:$0xff]   ;;  %vm1511_vm1 = vcmask 130048   ;;  %v397_v0 = vlaneseq  ;;  %s810_s20 = smov [#allocation5]  }
   0x5   :  { %v645_v6 = vunpack.c.l.bf16 %v644_v4  ;;  %v646_v7 = vunpack.c.h.bf16 %v644_v4  ;;  %v649_v8 = vunpack.c.l.bf16 %v651_v5  ;;  %v650_v9 = vunpack.c.h.bf16 %v651_v5  ;;  %v694_v17 = vld [vmem:[%s1507_s3 + $0x8] sm:$0xff]   ;;  %v697_v19 = vld [vmem:[%s1507_s3 + $0x10] sm:$0xff]   ;;  %v698_v21 = vld [vmem:[%s1507_s3 + $0x18] sm:$0xff]   ;;  %s601_s21 = sshll.u32 %s810_s20, 4  ;;  %s811_s22 = smov [#allocation7]   ;;  %s1450_s21 = int_to_ptr.vmem [resolvable:$true] %s601_s21 }
   0x6   :  { %v696_v18 = vld [vmem:[%s1507_s3 + $0x28] sm:$0xff]   ;;  %v699_v20 = vld [vmem:[%s1507_s3 + $0x30] sm:$0xff]   ;;  %v700_v22 = vld [vmem:[%s1507_s3 + $0x38] sm:$0xff]   ;;  %s611_s23 = sshll.u32 %s811_s22, 4  ;;  %s1465_s23 = int_to_ptr.vmem [resolvable:$true] %s611_s23 }
   0xc   :  { %v702_v3 = vpop.eup %701 }
   0xd   :  { %686 = vpush %v702_v3 }
  0x3e   :  { %s687_s30 = spop %686 }
  0x3f   :  { %v36_v10 = vstv %s687_s30 }
  0x40   :  { %v37_v11 = vmul.f32 %v645_v6, %v36_v10  ;;  %v38_v12 = vmul.f32 %v646_v7, %v36_v10  ;;  %v39_v13 = vmul.f32 %v649_v8, %v36_v10  ;;  %v40_v14 = vmul.f32 %v650_v9, %v36_v10 }
  0x41   :  { %v952_v6 = vshrl.u32 %v397_v0, 7 }
  0x42   :  { %v41_v15 = vpack.c.bf16 %v38_v12, %v37_v11  ;;  %v42_v16 = vpack.c.bf16 %v40_v14, %v39_v13 }
  0x43   :  { %v955_v9 = vadd.s32 16, %v952_v6  ;;  %v959_v12 = vadd.s32 80, %v952_v6  ;;  %v962_v13 = vadd.s32 24, %v952_v6  ;;  %v965_v14 = vadd.s32 64, %v952_v6 }
  0x44   :  { %662 = vmatprep.subr.bf16.mxu0 %v41_v15  ;;  %682 = vmatprep.subr.bf16.mxu1 %v41_v15 }
  0x45   :  { %663 = vmatpush3.bf16.msra.mxu0 %v41_v15  ;;  %684 = vmatpush3.bf16.msra.mxu1 %v41_v15  ;;  %1534 = vst [vmem:[#allocation12_spill] sm:$0xff] %v955_v9  ;;  %1535 = vst [vmem:[#allocation13_spill] sm:$0xff] %v959_v12  ;;  %v968_v15 = vadd.s32 8, %v952_v6 }
  0x46   :  { %664 = vmatprep.subr.bf16.mxu0 %v42_v16  ;;  %683 = vmatprep.subr.bf16.mxu1 %v42_v16  ;;  %1536 = vst [vmem:[#allocation14_spill] sm:$0xff] %v962_v13  ;;  %1537 = vst [vmem:[#allocation15_spill] sm:$0xff] %v965_v14 }
  0x47   :  { %1538 = vst [vmem:[#allocation16_spill] sm:$0xff] %v968_v15 }
  0x49   :  { %665 = vmatpush3.bf16.msra.mxu0 %v42_v16  ;;  %685 = vmatpush3.bf16.msra.mxu1 %v42_v16 }
  0x4c   :  { %667 = vmatmul.mubr.msk.bf16.vlgmr.msra.gmra.mrb[0].mxu0 %vm99_vm0, %v694_v17  ;;  %675 = vmatmul.mubr.msk.bf16.vlgmr.msra.gmra.mrb[0].mxu1 %vm99_vm0, %v696_v18  ;;  %v972_v18 = vadd.s32 88, %v952_v6 }
  0x4d   :  { %670 = vmatprep.mubr.msk.bf16.mxu0 %vm99_vm0, %v697_v19  ;;  %678 = vmatprep.mubr.msk.bf16.mxu1 %vm99_vm0, %v699_v20  ;;  %v975_v19 = vadd.s32 72, %v952_v6  ;;  %v978_v20 = vadd.s32 48, %v952_v6 }
  0x4e   :  { %1539 = vst [vmem:[#allocation17_spill] sm:$0xff] %v972_v18 }
  0x4f   :  { %1540 = vst [vmem:[#allocation18_spill] sm:$0xff] %v975_v19  ;;  %1541 = vst [vmem:[#allocation19_spill] sm:$0xff] %v978_v20 }
  0x54   :  { %671 = vmatmul.mubr.msk.bf16.gmra.mrb[4].mxu0 %vm99_vm0, %v698_v21  ;;  %679 = vmatmul.mubr.msk.bf16.gmra.mrb[4].mxu1 %vm99_vm0, %v700_v22  ;;  %v981_v21 = vadd.s32 32, %v952_v6  ;;  %v984_v22 = vadd.s32 112, %v952_v6 }
  0x56   :  { %1542 = vst [vmem:[#allocation20_spill] sm:$0xff] %v981_v21  ;;  %1543 = vst [vmem:[#allocation21_spill] sm:$0xff] %v984_v22 }
 0x11f   :  { %v888_v23 = vpop.f32.mrb[0].mxu0  ;;  %v890_v24 = vpop.f32.mrb[0].mxu1 }
 0x120   :  { %v892_v25 = vpop.f32.mrb[1].mxu0  ;;  %v894_v26 = vpop.f32.mrb[1].mxu1  ;;  %v224_v33 = vsel %vm1511_vm1, %v888_v23, -inf  ;;  %v238_v35 = vsel %vm1511_vm1, %v890_v24, -inf }
 0x121   :  { %1532 = vst [vmem:[#allocation10_spill] sm:$0xff] %v892_v25  ;;  %v896_v27 = vpop.f32.mrb[2].mxu0  ;;  %v898_v28 = vpop.f32.mrb[2].mxu1  ;;  %v222_v34 = vsel %vm1511_vm1, %v892_v25, -inf  ;;  %v234_v40 = vsel %vm1511_vm1, %v894_v26, -inf }
 0x122   :  { %v900_v29 = vpop.f32.mrb[3].mxu0  ;;  %v902_v30 = vpop.f32.mrb[3].mxu1  ;;  %v225_v39 = vsel %vm1511_vm1, %v896_v27, -inf  ;;  %v240_v55 = vsel %vm1511_vm1, %v898_v28, -inf }
 0x123   :  { %1533 = vst [vmem:[#allocation11_spill] sm:$0xff] %v900_v29  ;;  %v223_v45 = vsel %vm1511_vm1, %v900_v29, -inf  ;;  %v236_v58 = vsel %vm1511_vm1, %v902_v30, -inf }
 0x127   :  { %v904_v31 = vpop.f32.mrb[4].mxu0  ;;  %v906_v32 = vpop.f32.mrb[4].mxu1 }
 0x128   :  { %v230_v36 = vsel %vm1511_vm1, %v904_v31, -inf  ;;  %v916_v37 = vpop.f32.mrb[5].mxu0  ;;  %v918_v38 = vpop.f32.mrb[5].mxu1  ;;  %v246_v47 = vsel %vm1511_vm1, %v906_v32, -inf }
 0x129   :  { %v231_v41 = vmax.f32 %v224_v33, %v230_v36  ;;  %v226_v42 = vsel %vm1511_vm1, %v916_v37, -inf  ;;  %v926_v43 = vpop.f32.mrb[6].mxu0  ;;  %v928_v44 = vpop.f32.mrb[6].mxu1  ;;  %v242_v53 = vsel %vm1511_vm1, %v918_v38, -inf  ;;  %v987_v33 = vadd.s32 56, %v952_v6 }
 0x12a   :  { %v227_v46 = vmax.f32 %v222_v34, %v226_v42  ;;  %v232_v48 = vsel %vm1511_vm1, %v926_v43, -inf  ;;  %v936_v49 = vpop.f32.mrb[7].mxu0  ;;  %v938_v50 = vpop.f32.mrb[7].mxu1  ;;  %v248_v62 = vsel %vm1511_vm1, %v928_v44, -inf  ;;  %v995_v36 = vadd.s32 96, %v952_v6 }
 0x12b   :  { %v239_v51 = vmax.f32 %v231_v41, %v238_v35  ;;  %v233_v52 = vmax.f32 %v225_v39, %v232_v48  ;;  %v228_v54 = vsel %vm1511_vm1, %v936_v49, -inf  ;;  %v244_v2 = vsel %vm1511_vm1, %v938_v50, -inf  ;;  %1544 = vst [vmem:[#allocation22_spill] sm:$0xff] %v987_v33  ;;  %v992_v35 = vld [vmem:[%s1505_s1] ss:$0 sm:$0xff]  ;;  %s809_s1 = smov [#allocation3]  }
 0x12c   :  { %v235_v56 = vmax.f32 %v227_v46, %v234_v40  ;;  %v229_v57 = vmax.f32 %v223_v45, %v228_v54  ;;  %1545 = vst [vmem:[#allocation23_spill] sm:$0xff] %v992_v35  ;;  %1546 = vst [vmem:[#allocation24_spill] sm:$0xff] %v995_v36  ;;  %v998_v39 = vadd.s32 40, %v952_v6  ;;  %v1001_v40 = vadd.s32 120, %v952_v6  ;;  %s591_s19 = sshll.u32 %s809_s1, 4  ;;  %s592_s19 = int_to_ptr.vmem [resolvable:$true] %s591_s19 }
 0x12d   :  { %v247_v59 = vmax.f32 %v239_v51, %v246_v47  ;;  %v241_v60 = vmax.f32 %v233_v52, %v240_v55  ;;  %v1004_v41 = vadd.s32 104, %v952_v6  ;;  %vm419_vm2 = vcmp.eq.s32.totalorder %v952_v6, %v992_v35  ;;  %s739_s24 = scalar_lea.vmem %s592_s19, 16  ;;  %s743_s25 = scalar_lea.vmem %s592_s19, 32 }
 0x12e   :  { %v243_v61 = vmax.f32 %v235_v56, %v242_v53  ;;  %v237_v63 = vmax.f32 %v229_v57, %v236_v58  ;;  %1547 = vst [vmem:[#allocation25_spill] sm:$0xff] %v998_v39  ;;  %1548 = vst [vmem:[#allocation26_spill] sm:$0xff] %v1001_v40  ;;  %vm420_vm3 = vcmp.eq.s32.totalorder %v968_v15, %v992_v35  ;;  %p740_p0 = scmp.ne.s32.totalorder %s592_s19, %s739_s24  ;;  %p744_p1 = scmp.lt.s32.totalorder %s592_s19, %s592_s19 }
 0x12f   :  { %v249_v1 = vmax.f32 %v241_v60, %v248_v62  ;;  %1549 = vst [vmem:[#allocation27_spill] sm:$0xff] %v1004_v41  ;;  %vm421_vm4 = vcmp.eq.s32.totalorder %v955_v9, %v992_v35  ;;  %vm422_vm5 = vcmp.eq.s32.totalorder %v962_v13, %v992_v35  ;;  %vm423_vm6 = vcmp.eq.s32.totalorder %v981_v21, %v992_v35  ;;  %p745_p2 = scmp.lt.s32.totalorder %s743_s25, %s739_s24 }
 0x130   :  { %v245_v3 = vmax.f32 %v237_v63, %v244_v2  ;;  %vm425_vm7 = vcmp.eq.s32.totalorder %v978_v20, %v992_v35  ;;  %vm426_vm8 = vcmp.eq.s32.totalorder %v987_v33, %v992_v35  ;;  %vm424_vm9 = vcmp.eq.s32.totalorder %v998_v39, %v992_v35 }
 0x131   :  { %v251_v4 = vmax.f32 %v247_v59, %v249_v1  ;;  %vm429_vm10 = vcmp.eq.s32.totalorder %v959_v12, %v992_v35  ;;  %vm427_vm11 = vcmp.eq.s32.totalorder %v965_v14, %v992_v35  ;;  %vm428_vm12 = vcmp.eq.s32.totalorder %v975_v19, %v992_v35  ;;  %p746_p3 = por %p745_p2, %p744_p1 }
 0x132   :  { %v250_v5 = vmax.f32 %v243_v61, %v245_v3  ;;  %vm430_vm13 = vcmp.eq.s32.totalorder %v972_v18, %v992_v35  ;;  %vm431_vm14 = vcmp.eq.s32.totalorder %v995_v36, %v992_v35  ;;  %vm432_vm15 = vcmp.eq.s32.totalorder %v1004_v41, %v992_v35 }
 0x133   :  { %p747_p4 = pnand %p746_p3, %p740_p0 }
 0x134   :  { %v252_v7 = vmax.f32 %v250_v5, %v251_v4 }
 0x136   :  { %v253_v8 = vrot.slane %v252_v7, 4 }
 0x138   :  { %v254_v10 = vmax.f32 %v252_v7, %v253_v8 }
 0x13a   :  { %v255_v16 = vrot.slane %v254_v10, 2 }
 0x13c   :  { %v256_v34 = vmax.f32 %v254_v10, %v255_v16 }
 0x13e   :  { %v257_v47 = vrot.slane %v256_v34, 1 }
 0x140   :  { %v1020_v57 = vmax.f32 %v256_v34, %v257_v47 }
 0x142   :  { %v1040_v62 = vsub.f32 %v892_v25, %v1020_v57  ;;  %v1044_v63 = vsub.f32 %v900_v29, %v1020_v57  ;;  %v1048_v0 = vsub.f32 %v888_v23, %v1020_v57  ;;  %v1052_v1 = vsub.f32 %v896_v27, %v1020_v57 }
 0x143   :  { %v1062_v2 = vsub.f32 %v916_v37, %v1020_v57  ;;  %v1066_v3 = vsub.f32 %v936_v49, %v1020_v57  ;;  %v1070_v4 = vsub.f32 %v904_v31, %v1020_v57  ;;  %v1074_v5 = vsub.f32 %v926_v43, %v1020_v57 }
 0x144   :  { %v1082_v7 = vsub.f32 %v894_v26, %v1020_v57  ;;  %v1086_v8 = vsub.f32 %v902_v30, %v1020_v57  ;;  %v1090_v10 = vsub.f32 %v890_v24, %v1020_v57  ;;  %v1094_v16 = vsub.f32 %v898_v28, %v1020_v57 }
 0x145   :  { %v1102_v34 = vsub.f32 %v918_v38, %v1020_v57  ;;  %v1106_v47 = vsub.f32 %v938_v50, %v1020_v57  ;;  %v1110_v60 = vsub.f32 %v906_v32, %v1020_v57  ;;  %v1114_v55 = vsub.f32 %v928_v44, %v1020_v57 }
 0x146   :  { %v275_v61 = vmul.f32 1.442695, %v1040_v62  ;;  %v277_v58 = vmul.f32 1.442695, %v1044_v63  ;;  %v279_v51 = vmul.f32 1.442695, %v1048_v0  ;;  %vm498_vm1 = vcmp.eq.f32.partialorder %v892_v25, %v1020_v57 }
 0x147   :  { %v281_v42 = vmul.f32 1.442695, %v1052_v1  ;;  %v283_v52 = vmul.f32 1.442695, %v1062_v2  ;;  %v285_v46 = vmul.f32 1.442695, %v1066_v3  ;;  %vm499_vm0 = vcmp.eq.f32.partialorder %v900_v29, %v1020_v57 }
 0x148   :  { %703 = vpow2.f32 %v275_v61  ;;  %v287_v56 = vmul.f32 1.442695, %v1070_v4  ;;  %v289_v53 = vmul.f32 1.442695, %v1074_v5  ;;  %v291_v59 = vmul.f32 1.442695, %v1082_v7 }
 0x149   :  { %705 = vpow2.f32 %v277_v58  ;;  %v293_v54 = vmul.f32 1.442695, %v1086_v8  ;;  %v295_v45 = vmul.f32 1.442695, %v1090_v10  ;;  %v297_v17 = vmul.f32 1.442695, %v1094_v16 }
 0x14a   :  { %707 = vpow2.f32 %v279_v51  ;;  %v299_v48 = vmul.f32 1.442695, %v1102_v34  ;;  %v301_v11 = vmul.f32 1.442695, %v1106_v47  ;;  %v303_v61 = vmul.f32 1.442695, %v1110_v60 }
 0x14b   :  { %709 = vpow2.f32 %v281_v42  ;;  %v305_v40 = vmul.f32 1.442695, %v1114_v55  ;;  %v435_v58 = vsel %vm419_vm2, %v1040_v62, 0.0  ;;  %v436_v29 = vsel %vm420_vm3, %v1044_v63, 0.0 }
 0x14c   :  { %711 = vpow2.f32 %v283_v52  ;;  %v437_v51 = vsel %vm421_vm4, %v1048_v0, 0.0  ;;  %v438_v42 = vsel %vm422_vm5, %v1052_v1, 0.0  ;;  %v439_v25 = vsel %vm423_vm6, %v1062_v2, 0.0 }
 0x14d   :  { %713 = vpow2.f32 %v285_v46  ;;  %v440_v52 = vsel %vm424_vm9, %v1066_v3, 0.0  ;;  %v441_v9 = vsel %vm425_vm7, %v1070_v4, 0.0  ;;  %v442_v13 = vsel %vm426_vm8, %v1074_v5, 0.0 }
 0x14e   :  { %715 = vpow2.f32 %v287_v56  ;;  %v1172_v46 = vsel %vm427_vm11, %v1082_v7, 0.0  ;;  %v1178_v39 = vsel %vm428_vm12, %v1086_v8, 0.0  ;;  %v1184_v20 = vsel %vm429_vm10, %v1090_v10, 0.0 }
 0x14f   :  { %717 = vpow2.f32 %v289_v53  ;;  %v1190_v56 = vsel %vm430_vm13, %v1094_v16, 0.0  ;;  %v1196_v19 = vsel %vm431_vm14, %v1102_v34, 0.0  ;;  %v1202_v12 = vsel %vm432_vm15, %v1106_v47, 0.0 }
 0x150   :  { %719 = vpow2.f32 %v291_v59  ;;  %vm1550_vm2 = vcmp.eq.s32.totalorder %v984_v22, %v992_v35  ;;  %vm1551_vm3 = vcmask 130048  }
 0x151   :  { %v1208_v53 = vsel %vm1550_vm2, %v1110_v60, 0.0  ;;  %v451_v18 = vsel %vm1551_vm3, %v435_v58, 0.0  ;;  %vm1552_vm4 = vmmov %vm1551_vm3  ;;  %721 = vpow2.f32 %v293_v54 }
 0x152   :  { %v452_v14 = vsel %vm1552_vm4, %v436_v29, 0.0  ;;  %vm1553_vm5 = vmmov %vm1551_vm3  ;;  %v704_v41 = vpop.eup %703  ;;  %723 = vpow2.f32 %v295_v45 }
 0x153   :  { %v453_v36 = vadd.f32 %v452_v14, %v451_v18  ;;  %v454_v33 = vsel %vm1553_vm5, %v437_v51, 0.0  ;;  %vm1554_vm6 = vmmov %vm1551_vm3  ;;  %v706_v58 = vpop.eup %705  ;;  %725 = vpow2.f32 %v297_v17  ;;  %v344_v14 = vmul.f32 %v704_v41, %v1040_v62 }
 0x154   :  { %v1214_v21 = vsel %vm1554_vm6, %v438_v42, 0.0  ;;  %vm1555_vm7 = vmmov %vm1551_vm3  ;;  %v708_v54 = vpop.eup %707  ;;  %727 = vpow2.f32 %v299_v48 }
 0x155   :  { %v1217_v59 = vsel %vm1555_vm7, %v439_v25, 0.0  ;;  %vm1556_vm8 = vmmov %vm1551_vm3  ;;  %v1227_v18 = vadd.f32 %v454_v33, %v453_v36  ;;  %v345_v25 = vmul.f32 %v706_v58, %v1044_v63  ;;  %v710_v42 = vpop.eup %709  ;;  %729 = vpow2.f32 %v301_v11 }
 0x156   :  { %v1220_v22 = vsel %vm1556_vm8, %v440_v52, 0.0  ;;  %vm1557_vm9 = vmmov %vm1551_vm3  ;;  %v346_v52 = vmul.f32 %v708_v54, %v1048_v0  ;;  %v712_v15 = vpop.eup %711  ;;  %731 = vpow2.f32 %v303_v61  ;;  %v347_v36 = vmul.f32 %v710_v42, %v1052_v1 }
 0x157   :  { %v1223_v35 = vsel %vm1557_vm9, %v441_v9, 0.0  ;;  %vm1558_vm10 = vmmov %vm1551_vm3  ;;  %v714_v48 = vpop.eup %713  ;;  %733 = vpow2.f32 %v305_v40  ;;  %v348_v11 = vmul.f32 %v712_v15, %v1062_v2 }
 0x158   :  { %v307_v29 = vsel %vm1558_vm10, %v704_v41, 0.0  ;;  %vm1559_vm11 = vmmov %vm1551_vm3  ;;  %v716_v63 = vpop.eup %715  ;;  %v349_v0 = vmul.f32 %v714_v48, %v1066_v3 }
 0x159   :  { %v308_v45 = vsel %vm1559_vm11, %v706_v58, 0.0  ;;  %vm1560_vm12 = vmmov %vm1551_vm3  ;;  %v350_v40 = vmul.f32 %v716_v63, %v1070_v4 }
 0x15a   :  { %v1232_v51 = vsel %vm1560_vm12, %v442_v13, 0.0  ;;  %v309_v9 = vadd.f32 %v308_v45, %v307_v29  ;;  %vm1561_vm13 = vmmov %vm1551_vm3 }
 0x15b   :  { %v310_v17 = vsel %vm1561_vm13, %v708_v54, 0.0  ;;  %vm1562_vm14 = vmmov %vm1551_vm3  ;;  %v718_v54 = vpop.eup %717 }
 0x15c   :  { %v312_v33 = vsel %vm1562_vm14, %v710_v42, 0.0  ;;  %vm1563_vm15 = vmmov %vm1551_vm3  ;;  %v311_v62 = vadd.f32 %v310_v17, %v309_v9  ;;  %v720_v42 = vpop.eup %719 }
 0x15d   :  { %v360_v41 = vsel %vm1563_vm15, %v344_v14, 0.0  ;;  %vm1564_vm2 = vmmov %vm1551_vm3  ;;  %v722_v17 = vpop.eup %721 }
 0x15e   :  { %v314_v13 = vsel %vm1564_vm2, %v712_v15, 0.0  ;;  %vm1565_vm3 = vmmov %vm1564_vm2  ;;  %v313_v1 = vadd.f32 %v312_v33, %v311_v62  ;;  %v351_v15 = vmul.f32 %v718_v54, %v1074_v5  ;;  %v352_v33 = vmul.f32 %v720_v42, %v1082_v7  ;;  %v724_v62 = vpop.eup %723 }
 0x15f   :  { %v316_v58 = vsel %vm1565_vm3, %v714_v48, 0.0  ;;  %vm1566_vm4 = vmmov %vm1564_vm2 }
 0x160   :  { %v361_v61 = vsel %vm1566_vm4, %v345_v25, 0.0  ;;  %vm1567_vm5 = vmmov %vm1564_vm2  ;;  %v315_v25 = vadd.f32 %v314_v13, %v313_v1  ;;  %v354_v13 = vmul.f32 %v724_v62, %v1090_v10 }
 0x161   :  { %v363_v29 = vsel %vm1567_vm5, %v346_v52, 0.0  ;;  %vm1568_vm6 = vmmov %vm1564_vm2  ;;  %v362_v45 = vadd.f32 %v361_v61, %v360_v41  ;;  %v353_v41 = vmul.f32 %v722_v17, %v1086_v8  ;;  %v726_v61 = vpop.eup %725 }
 0x162   :  { %v318_v14 = vsel %vm1568_vm6, %v716_v63, 0.0  ;;  %vm1569_vm7 = vmmov %vm1564_vm2  ;;  %v728_v1 = vpop.eup %727 }
 0x163   :  { %v320_v9 = vsel %vm1569_vm7, %v718_v54, 0.0  ;;  %vm1570_vm8 = vmmov %vm1564_vm2  ;;  %v364_v48 = vadd.f32 %v363_v29, %v362_v45  ;;  %v355_v29 = vmul.f32 %v726_v61, %v1094_v16  ;;  %v373_v45 = vsel %vm1564_vm2, %v351_v15, 0.0 }
 0x164   :  { %v365_v2 = vsel %vm1570_vm8, %v347_v36, 0.0  ;;  %vm1571_vm9 = vmmov %vm1564_vm2  ;;  %v317_v36 = vadd.f32 %v316_v58, %v315_v25  ;;  %v356_v58 = vmul.f32 %v728_v1, %v1102_v34 }
 0x165   :  { %v367_v3 = vsel %vm1571_vm9, %v348_v11, 0.0  ;;  %vm1572_vm10 = vmmov %vm1564_vm2  ;;  %v366_v54 = vadd.f32 %v365_v2, %v364_v48 }
 0x166   :  { %v322_v52 = vsel %vm1572_vm10, %v720_v42, 0.0  ;;  %vm1573_vm11 = vmmov %vm1564_vm2  ;;  %v730_v42 = vpop.eup %729 }
 0x167   :  { %v324_v4 = vsel %vm1573_vm11, %v722_v17, 0.0  ;;  %vm1574_vm12 = vmmov %vm1564_vm2  ;;  %v368_v17 = vadd.f32 %v367_v3, %v366_v54  ;;  %v1265_v25 = vpop.eup %731  ;;  %v357_v2 = vmul.f32 %v730_v42, %v1106_v47 }
 0x168   :  { %v369_v63 = vsel %vm1574_vm12, %v349_v0, 0.0  ;;  %vm1575_vm13 = vmmov %vm1564_vm2  ;;  %v319_v0 = vadd.f32 %v318_v14, %v317_v36  ;;  %v1271_v15 = vpop.eup %733  ;;  %v358_v14 = vmul.f32 %v1265_v25, %v1110_v60 }
 0x169   :  { %v371_v5 = vsel %vm1575_vm13, %v350_v40, 0.0  ;;  %vm1576_vm14 = vmmov %vm1564_vm2  ;;  %v359_v3 = vmul.f32 %v1271_v15, %v1114_v55 }
 0x16a   :  { %v326_v11 = vsel %vm1576_vm14, %v724_v62, 0.0  ;;  %vm1577_vm15 = vmmov %vm1564_vm2  ;;  %v370_v62 = vadd.f32 %v369_v63, %v368_v17 }
 0x16b   :  { %v328_v7 = vsel %vm1577_vm15, %v726_v61, 0.0  ;;  %vm1578_vm3 = vmmov %vm1564_vm2 }
 0x16c   :  { %v375_v8 = vsel %vm1578_vm3, %v352_v33, 0.0  ;;  %vm1579_vm4 = vmmov %vm1564_vm2  ;;  %v321_v33 = vadd.f32 %v320_v9, %v319_v0 }
 0x16d   :  { %v330_v40 = vsel %vm1579_vm4, %v728_v1, 0.0  ;;  %vm1580_vm5 = vmmov %vm1564_vm2 }
 0x16e   :  { %v332_v10 = vsel %vm1580_vm5, %v730_v42, 0.0  ;;  %vm1581_vm6 = vmmov %vm1564_vm2  ;;  %v323_v36 = vadd.f32 %v322_v52, %v321_v33  ;;  %v472_v52 = vsel %vm1564_vm2, %v1190_v56, 0.0  ;;  %v1601_v33 = vld [vmem:[#allocation14_spill] sm:$0xff] }
 0x16f   :  { %v377_v48 = vsel %vm1581_vm6, %v353_v41, 0.0  ;;  %vm1582_vm7 = vmmov %vm1564_vm2  ;;  %v457_v41 = vadd.f32 %v1214_v21, %v1227_v18  ;;  %vm500_vm6 = vcmp.eq.f32.partialorder %v888_v23, %v1020_v57 }
 0x170   :  { %v379_v16 = vsel %vm1582_vm7, %v354_v13, 0.0  ;;  %vm1583_vm8 = vmmov %vm1564_vm2  ;;  %v372_v13 = vadd.f32 %v371_v5, %v370_v62  ;;  %v325_v21 = vadd.f32 %v324_v4, %v323_v36  ;;  %vm501_vm7 = vcmp.eq.f32.partialorder %v896_v27, %v1020_v57 }
 0x171   :  { %v381_v34 = vsel %vm1583_vm8, %v355_v29, 0.0  ;;  %vm1584_vm9 = vmmov %vm1564_vm2  ;;  %v459_v54 = vadd.f32 %v1217_v59, %v457_v41  ;;  %vm502_vm8 = vcmp.eq.f32.partialorder %v916_v37, %v1020_v57 }
 0x172   :  { %v383_v61 = vsel %vm1584_vm9, %v356_v58, 0.0  ;;  %vm1585_vm10 = vmmov %vm1564_vm2  ;;  %v374_v18 = vadd.f32 %v373_v45, %v372_v13  ;;  %vm503_vm9 = vcmp.eq.f32.partialorder %v936_v49, %v1020_v57  ;;  %v1596_v45 = vld [vmem:[#allocation16_spill] sm:$0xff]  ;;  %v1607_v13 = vld [vmem:[#allocation19_spill] sm:$0xff] }
 0x173   :  { %v385_v47 = vsel %vm1585_vm10, %v357_v2, 0.0  ;;  %vm1586_vm11 = vmmov %vm1564_vm2  ;;  %vm504_vm10 = vcmp.eq.f32.partialorder %v904_v31, %v1020_v57  ;;  %v1599_v2 = vld [vmem:[#allocation12_spill] sm:$0xff] }
 0x174   :  { %v1283_v9 = vsel %vm1586_vm11, %v358_v14, 0.0  ;;  %vm1587_vm12 = vmmov %vm1564_vm2  ;;  %v376_v59 = vadd.f32 %v375_v8, %v374_v18  ;;  %vm505_vm11 = vcmp.eq.f32.partialorder %v926_v43, %v1020_v57  ;;  %v1597_v8 = vcvt.s32.f32 %v1596_v45  ;;  %v1611_v18 = vld [vmem:[#allocation22_spill] sm:$0xff] }
 0x175   :  { %v466_v60 = vsel %vm1587_vm12, %v1172_v46, 0.0  ;;  %vm1588_vm13 = vmmov %vm1564_vm2  ;;  %v461_v46 = vadd.f32 %v1220_v22, %v459_v54  ;;  %vm506_vm12 = vcmp.eq.f32.partialorder %v894_v26, %v1020_v57  ;;  %v1609_v54 = vld [vmem:[#allocation23_spill] sm:$0xff] }
 0x176   :  { %v1288_v63 = vsel %vm1588_vm13, %v359_v3, 0.0  ;;  %vm1589_vm14 = vmmov %vm1564_vm2  ;;  %v378_v22 = vadd.f32 %v377_v48, %v376_v59  ;;  %vm507_vm13 = vcmp.eq.f32.partialorder %v902_v30, %v1020_v57  ;;  %v1600_v48 = vcvt.s32.f32 %v1599_v2  ;;  %v1603_v3 = vld [vmem:[#allocation20_spill] sm:$0xff] }
 0x177   :  { %v468_v1 = vsel %vm1589_vm14, %v1178_v39, 0.0  ;;  %vm1590_vm15 = vmmov %vm1564_vm2  ;;  %vm508_vm14 = vcmp.eq.f32.partialorder %v890_v24, %v1020_v57  ;;  %v1604_v41 = vcvt.s32.f32 %v1603_v3 }
 0x178   :  { %v470_v29 = vsel %vm1590_vm15, %v1184_v20, 0.0  ;;  %vm1591_vm3 = vmmov %vm1564_vm2  ;;  %v327_v20 = vadd.f32 %v326_v11, %v325_v21  ;;  %vm509_vm15 = vcmp.eq.f32.partialorder %v898_v28, %v1020_v57 }
 0x179   :  { %v474_v5 = vsel %vm1591_vm3, %v1196_v19, 0.0  ;;  %vm1592_vm4 = vmmov %vm1564_vm2  ;;  %v463_v19 = vadd.f32 %v1223_v35, %v461_v46  ;;  %vm511_vm3 = vcmp.eq.f32.partialorder %v938_v50, %v1020_v57  ;;  %v1612_v46 = vcvt.s32.f32 %v1611_v18 }
 0x17a   :  { %v1302_v42 = vsel %vm1592_vm4, %v1202_v12, 0.0  ;;  %vm1593_vm5 = vmmov %vm1564_vm2  ;;  %v329_v12 = vadd.f32 %v328_v7, %v327_v20  ;;  %vm510_vm2 = vcmp.eq.f32.partialorder %v918_v38, %v1020_v57  ;;  %vm512_vm4 = vcmp.eq.f32.partialorder %v906_v32, %v1020_v57  ;;  %v1613_v20 = vld [vmem:[#allocation15_spill] sm:$0xff] }
 0x17b   :  { %v1306_v39 = vsel %vm1593_vm5, %v1208_v53, 0.0  ;;  %v465_v56 = vadd.f32 %v1232_v51, %v463_v19  ;;  %v380_v53 = vadd.f32 %v379_v16, %v378_v22  ;;  %vm513_vm5 = vcmp.eq.f32.partialorder %v928_v44, %v1020_v57  ;;  %v1615_v19 = vld [vmem:[#allocation18_spill] sm:$0xff] }
 0x17c   :  { %v331_v35 = vadd.f32 %v330_v40, %v329_v12  ;;  %v1594_v51 = vcvt.s32.f32 %v952_v6  ;;  %v531_v40 = vsel %vm499_vm0, %v1597_v8, 128.0  ;;  %v532_v16 = vsel %vm500_vm6, %v1600_v48, 128.0  ;;  %v1625_v8 = vld [vmem:[#allocation21_spill] sm:$0xff] }
 0x17d   :  { %v467_v4 = vadd.f32 %v466_v60, %v465_v56  ;;  %v382_v17 = vadd.f32 %v381_v34, %v380_v53  ;;  %v1602_v6 = vcvt.s32.f32 %v1601_v33  ;;  %v1605_v34 = vld [vmem:[#allocation25_spill] sm:$0xff]  ;;  %v1608_v60 = vcvt.s32.f32 %v1607_v13 }
 0x17e   :  { %v530_v7 = vsel %vm498_vm1, %v1594_v51, 128.0  ;;  %v333_v58 = vadd.f32 %v332_v10, %v331_v35  ;;  %v534_v10 = vsel %vm502_vm8, %v1604_v41, 128.0  ;;  %v1606_v36 = vcvt.s32.f32 %v1605_v34  ;;  %v1619_v35 = vld [vmem:[#allocation17_spill] sm:$0xff] }
 0x17f   :  { %v533_v14 = vsel %vm501_vm7, %v1602_v6, 128.0  ;;  %v469_v62 = vadd.f32 %v468_v1, %v467_v4  ;;  %v536_v27 = vsel %vm504_vm10, %v1608_v60, 128.0  ;;  %v1610_v1 = vld [vmem:[#allocation26_spill] sm:$0xff]  ;;  %v384_v21 = vadd.f32 %v383_v61, %v382_v17  ;;  %v1617_v61 = vld [vmem:[#allocation13_spill] sm:$0xff]  ;;  %v1621_v4 = vld [vmem:[#allocation24_spill] sm:$0xff] }
 0x180   :  { %v535_v23 = vsel %vm503_vm9, %v1606_v36, 128.0  ;;  %vm434_vm1 = vcmp.eq.s32.totalorder %v1610_v1, %v1609_v54  ;;  %v537_v37 = vsel %vm505_vm11, %v1612_v46, 128.0  ;;  %v1614_v59 = vcvt.s32.f32 %v1613_v20 }
 0x181   :  { %v1616_v12 = vcvt.s32.f32 %v1615_v19  ;;  %v471_v22 = vadd.f32 %v470_v29, %v469_v62  ;;  %v1618_v56 = vcvt.s32.f32 %v1617_v61  ;;  %v1620_v53 = vcvt.s32.f32 %v1619_v35  ;;  %v1623_v29 = vld [vmem:[#allocation27_spill] sm:$0xff] }
 0x182   :  { %v538_v49 = vsel %vm506_vm12, %v1614_v59, 128.0  ;;  %v1622_v51 = vcvt.s32.f32 %v1621_v4  ;;  %v386_v11 = vadd.f32 %v385_v47, %v384_v21  ;;  %v1624_v45 = vcvt.s32.f32 %v1623_v29 }
 0x183   :  { %v539_v31 = vsel %vm507_vm13, %v1616_v12, 128.0  ;;  %v540_v43 = vsel %vm508_vm14, %v1618_v56, 128.0  ;;  %v541_v26 = vsel %vm509_vm15, %v1620_v53, 128.0  ;;  %v1626_v0 = vcvt.s32.f32 %v1625_v8 }
 0x184   :  { %v542_v30 = vsel %vm510_vm2, %v1622_v51, 128.0  ;;  %v543_v24 = vsel %vm511_vm3, %v1624_v45, 128.0  ;;  %v1627_v17 = vcvt.s32.f32 %v1610_v1  ;;  %v473_v2 = vadd.f32 %v472_v52, %v471_v22 }
 0x185   :  { %v544_v28 = vsel %vm512_vm4, %v1626_v0, 128.0  ;;  %vm1628_vm0 = vcmask 130048   ;;  %v388_v33 = vadd.f32 %v1283_v9, %v386_v11 }
 0x186   :  { %v545_v38 = vsel %vm513_vm5, %v1627_v17, 128.0  ;;  %v546_v47 = vsel %vm1628_vm0, %v530_v7, inf  ;;  %vm1629_vm6 = vmmov %vm1628_vm0  ;;  %v475_v3 = vadd.f32 %v474_v5, %v473_v2 }
 0x187   :  { %v547_v48 = vsel %vm1629_vm6, %v531_v40, inf  ;;  %vm1630_vm7 = vmmov %vm1628_vm0  ;;  %v390_v57 = vadd.f32 %v1288_v63, %v388_v33  ;;  %v572_v46 = vsel %vm1628_vm0, %v545_v38, inf }
 0x188   :  { %v548_v50 = vsel %vm1630_vm7, %v532_v16, inf  ;;  %vm1631_vm8 = vmmov %vm1628_vm0  ;;  %v477_v9 = vadd.f32 %v1302_v42, %v475_v3 }
 0x189   :  { %v549_v6 = vsel %vm1631_vm8, %v533_v14, inf  ;;  %vm1632_vm9 = vmmov %vm1628_vm0  ;;  %v391_v4 = vrot.slane %v390_v57, 4 }
 0x18a   :  { %v550_v32 = vsel %vm1632_vm9, %v534_v10, inf  ;;  %vm1633_vm10 = vmmov %vm1628_vm0  ;;  %v479_v63 = vadd.f32 %v1306_v39, %v477_v9  ;;  %v450_v39 = vsel %vm434_vm1, %v1114_v55, 0.0  ;;  %vm491_vm1 = vcmask 122880  }
 0x18b   :  { %v552_v62 = vsel %vm1633_vm10, %v535_v23, inf  ;;  %v551_v41 = vmin.f32 %v546_v47, %v550_v32  ;;  %vm1634_vm11 = vmmov %vm1628_vm0 }
 0x18c   :  { %v553_v34 = vmin.f32 %v547_v48, %v552_v62  ;;  %v554_v44 = vsel %vm1634_vm11, %v536_v27, inf  ;;  %vm1635_vm12 = vmmov %vm1628_vm0 }
 0x18d   :  { %v555_v52 = vmin.f32 %v548_v50, %v554_v44  ;;  %v556_v7 = vsel %vm1635_vm12, %v537_v37, inf  ;;  %vm1636_vm13 = vmmov %vm1628_vm0 }
 0x18e   :  { %v558_v40 = vsel %vm1636_vm13, %v538_v49, inf  ;;  %v557_v16 = vmin.f32 %v549_v6, %v556_v7  ;;  %vm1637_vm14 = vmmov %vm1628_vm0 }
 0x18f   :  { %v559_v14 = vmin.f32 %v551_v41, %v558_v40  ;;  %v560_v10 = vsel %vm1637_vm14, %v539_v31, inf  ;;  %vm1638_vm15 = vmmov %vm1628_vm0 }
 0x190   :  { %v561_v36 = vmin.f32 %v553_v34, %v560_v10  ;;  %v562_v5 = vsel %vm1638_vm15, %v540_v43, inf  ;;  %vm1639_vm2 = vmmov %vm1628_vm0 }
 0x191   :  { %v564_v23 = vsel %vm1639_vm2, %v541_v26, inf  ;;  %vm1640_vm3 = vmmov %vm1628_vm0  ;;  %v563_v60 = vmin.f32 %v555_v52, %v562_v5 }
 0x192   :  { %v566_v13 = vsel %vm1640_vm3, %v542_v30, inf  ;;  %v565_v27 = vmin.f32 %v557_v16, %v564_v23  ;;  %vm1641_vm4 = vmmov %vm1628_vm0 }
 0x193   :  { %v567_v21 = vmin.f32 %v559_v14, %v566_v13  ;;  %v568_v18 = vsel %vm1641_vm4, %v543_v24, inf  ;;  %vm1642_vm5 = vmmov %vm1628_vm0 }
 0x194   :  { %v570_v42 = vsel %vm1642_vm5, %v544_v28, inf  ;;  %vm1643_vm6 = vmmov %vm1628_vm0  ;;  %v569_v20 = vmin.f32 %v561_v36, %v568_v18  ;;  %v573_v49 = vmin.f32 %v565_v27, %v572_v46 }
 0x195   :  { %v334_v37 = vsel %vm1643_vm6, %v1265_v25, 0.0  ;;  %v571_v59 = vmin.f32 %v563_v60, %v570_v42  ;;  %vm1644_vm7 = vmmov %vm1628_vm0 }
 0x196   :  { %v335_v19 = vadd.f32 %v334_v37, %v333_v58  ;;  %v480_v12 = vsel %vm1644_vm7, %v450_v39, 0.0  ;;  %v574_v31 = vmin.f32 %v567_v21, %v569_v20  ;;  %vm1645_vm8 = vmmov %vm1628_vm0  ;;  %v392_v58 = vadd.f32 %v391_v4, %v390_v57 }
 0x197   :  { %v575_v22 = vmin.f32 %v571_v59, %v573_v49  ;;  %v336_v61 = vsel %vm1645_vm8, %v1271_v15, 0.0  ;;  %v481_v56 = vadd.f32 %v480_v12, %v479_v63 }
 0x198   :  { %v337_v43 = vadd.f32 %v336_v61, %v335_v19  ;;  %v393_v0 = vrot.slane %v392_v58, 2 }
 0x199   :  { %v576_v35 = vmin.f32 %v574_v31, %v575_v22  ;;  %v482_v51 = vrot.slane %v481_v56, 4 }
 0x19a   :  { %v338_v25 = vrot.slane %v337_v43, 4  ;;  %v394_v38 = vadd.f32 %v393_v0, %v392_v58 }
 0x19b   :  { %v577_v53 = vrot.slane %v576_v35, 4  ;;  %v483_v1 = vadd.f32 %v482_v51, %v481_v56 }
 0x19c   :  { %v339_v26 = vadd.f32 %v338_v25, %v337_v43  ;;  %v395_v48 = vrot.slane %v394_v38, 1 }
 0x19d   :  { %v578_v30 = vmin.f32 %v576_v35, %v577_v53  ;;  %v484_v15 = vrot.slane %v483_v1, 2 }
 0x19e   :  { %v340_v11 = vrot.slane %v339_v26, 2  ;;  %v396_v6 = vadd.f32 %v395_v48, %v394_v38 }
 0x19f   :  { %v579_v54 = vrot.slane %v578_v30, 2  ;;  %v485_v2 = vadd.f32 %v484_v15, %v483_v1 }
 0x1a0   :  { %v341_v55 = vadd.f32 %v340_v11, %v339_v26 }
 0x1a1   :  { %v580_v29 = vmin.f32 %v578_v30, %v579_v54  ;;  %v486_v50 = vrot.slane %v485_v2, 1 }
 0x1a2   :  { %v342_v45 = vrot.slane %v341_v55, 1 }
 0x1a3   :  { %v581_v24 = vrot.slane %v580_v29, 1  ;;  %v487_v3 = vadd.f32 %v486_v50, %v485_v2 }
 0x1a4   :  { %v343_v8 = vadd.f32 %v342_v45, %v341_v55 }
 0x1a5   :  { %v582_v28 = vmin.f32 %v580_v29, %v581_v24 }
 0x1a6   :  { %735 = vlog2.f32 %v343_v8 }
 0x1a7   :  { %737 = vrcp.f32 %v343_v8  ;;  %v688_v17 = vtrunc.f32 %v582_v28 }
 0x1a9   :  { %v689_v47 = vcvt.f32.s32 %v688_v17 }
 0x1ab   :  { %584 = vst.msk [vmem:[#allocation7] sm:$0x1] %vm491_vm1, %v689_v47 }
 0x1b0   :  { %v736_v33 = vpop.eup %735 }
 0x1b1   :  { %v738_v32 = vpop.eup %737  ;;  %v489_v62 = vmul.f32 0.6931472, %v736_v33 }
 0x1b2   :  { %v494_v41 = vmul.f32 %v738_v32, %v396_v6 }
 0x1b3   :  { %v490_v34 = vsub.f32 %v489_v62, %v487_v3 }
 0x1b4   :  { %v495_v44 = vsub.f32 %v494_v41, %v489_v62 }
 0x1b5   :  { %492 = vst.msk [vmem:[#allocation3] sm:$0x1] %vm491_vm1, %v490_v34 }
 0x1b6   :  { %v496_v57 = vadd.f32 4.8520303, %v495_v44 }
 0x1b7   :  { %750 = shalt.err (!%p747_p4)
}
 0x1b8   :  { %s751_s28 = scalar_lea.hbm %s1508_s4, 16 }
 0x1b9   :  { %p752_p5 = scmp.ne.s32.totalorder %s1508_s4, %s751_s28  ;;  %p755_p6 = scmp.lt.u32.totalorder %s751_s28, %s1508_s4 }
 0x1bb   :  { %p757_p7 = pnand %p755_p6, %p752_p5 }
 0x1bd   :  { %760 = shalt.err (!%p757_p7)
}
 0x1be   :  { %594 = dma.vmem_to_hbm [thread:$0]  %s592_s19, 16, %s1508_s4, [#allocation4]   ;;  %497 = vst.msk [vmem:[#allocation5] sm:$0x1] %vm491_vm1, %v496_v57 }
 0x1bf   :  { %s761_s9 = scalar_lea.vmem %s1450_s21, 16  ;;  %s765_s10 = scalar_lea.vmem %s1450_s21, 32 }
 0x1c0   :  { %p762_p8 = scmp.ne.s32.totalorder %s1450_s21, %s761_s9  ;;  %p766_p9 = scmp.lt.s32.totalorder %s1450_s21, %s1450_s21 }
 0x1c1   :  { %p767_p10 = scmp.lt.s32.totalorder %s765_s10, %s761_s9 }
 0x1c3   :  { %p768_p11 = por %p767_p10, %p766_p9 }
 0x1c5   :  { %p769_p12 = pnand %p768_p11, %p762_p8 }
 0x1c7   :  { %772 = shalt.err (!%p769_p12)
}
 0x1c8   :  { %s773_s13 = scalar_lea.hbm %s1509_s5, 16 }
 0x1c9   :  { %p774_p13 = scmp.ne.s32.totalorder %s1509_s5, %s773_s13  ;;  %p777_p0 = scmp.lt.u32.totalorder %s773_s13, %s1509_s5 }
 0x1cb   :  { %p779_p1 = pnand %p777_p0, %p774_p13 }
 0x1cd   :  { %782 = shalt.err (!%p779_p1)
}
 0x1ce   :  { %604 = dma.vmem_to_hbm [thread:$0]  %s1450_s21, 16, %s1509_s5, [#allocation6]  }
 0x1cf   :  { %s783_s18 = scalar_lea.vmem %s1465_s23, 16  ;;  %s787_s1 = scalar_lea.vmem %s1465_s23, 32 }
 0x1d0   :  { %p784_p2 = scmp.ne.s32.totalorder %s1465_s23, %s783_s18  ;;  %p788_p3 = scmp.lt.s32.totalorder %s1465_s23, %s1465_s23 }
 0x1d1   :  { %p789_p4 = scmp.lt.s32.totalorder %s787_s1, %s783_s18 }
 0x1d3   :  { %p790_p5 = por %p789_p4, %p788_p3 }
 0x1d5   :  { %p791_p6 = pnand %p790_p5, %p784_p2 }
 0x1d7   :  { %794 = shalt.err (!%p791_p6)
}
 0x1d8   :  { %s795_s22 = scalar_lea.hbm %s1510_s6, 16 }
 0x1d9   :  { %p796_p7 = scmp.ne.s32.totalorder %s1510_s6, %s795_s22  ;;  %p799_p8 = scmp.lt.u32.totalorder %s795_s22, %s1510_s6 }
 0x1db   :  { %p801_p9 = pnand %p799_p8, %p796_p7 }
 0x1dd   :  { %804 = shalt.err (!%p801_p9)
}
 0x1de   :  { %614 = dma.vmem_to_hbm [thread:$0]  %s1465_s23, 16, %s1510_s6, [#allocation6]  }
 0x1df   :  { %805 = dma.done.wait [#allocation4], 16  }
 0x1e0   :  { %806 = vsyncadd [#allocation4], 4294967280 }
 0x1e1   :  { %807 = dma.done.wait [#allocation6], 32  }
 0x1e2   :  { %808 = vsyncadd [#allocation6], 4294967264 }
 0x1e3   :  { %624 = vsyncpa [#allocation4], 1 }
 0x1e4   :  { %625 = vsyncpa [#allocation6], 1 }

</bundles_post_ra>
